<compile_context>
chip_gen: v6e
topology: v6e:2x2x1
jax: 0.10.0
libtpu: 0.0.40
codegen_flags: <defaults>
</compile_context>

<pallas_src>
import math

import jax
import jax.numpy as jnp
from jax import lax
from jax.experimental import pallas as pl
from jax.experimental.pallas import tpu as pltpu


def mhca_kernel(q_ref, kv_ref,
                wq_ref, bq_ref, wk_ref, bk_ref, wv_ref, bv_ref,
                wfold_ref, bfold_ref,
                out_ref,
                kp_ref, vp_ref):
    """One grid step == (one batch element, one Q-row tile)."""
    q = q_ref[0]                            # (TQ, E)
    H, d, E_pad = wfold_ref.shape
    E = H * d
    in_dtype = q.dtype
    scale = 1.0 / math.sqrt(d)

    # K/V projections: computed once per batch element (first Q tile), kept in
    # VMEM scratch for the remaining Q tiles of this batch element.
    @pl.when(pl.program_id(1) == 0)
    def _():
        kv = kv_ref[0]                      # (Lkv, E)
        kp_ref[...] = (jnp.dot(kv, wk_ref[...], preferred_element_type=jnp.float32)
                       + bk_ref[...]).astype(kp_ref.dtype)
        vp_ref[...] = (jnp.dot(kv, wv_ref[...], preferred_element_type=jnp.float32)
                       + bv_ref[...]).astype(vp_ref.dtype)

    # Q projection (lane-dense, contraction depth E); fold 1/sqrt(d) into Q
    # (Lq*E elements instead of Lq*Lkv score elements).
    qp = jnp.dot(q, wq_ref[...], preferred_element_type=jnp.float32) + bq_ref[...]
    qp = (qp * scale).astype(in_dtype)      # (TQ, E)
    kp = kp_ref[...]                        # (Lkv, E)
    vp = vp_ref[...]                        # (Lkv, E)

    acc = jnp.zeros((q.shape[0], E_pad), jnp.float32)
    for h in range(H):                      # static unroll; single f32 accumulator
        sl = slice(h * d, (h + 1) * d)
        qh, kh, vh = qp[:, sl], kp[:, sl], vp[:, sl]

        # q @ k^T without materialising kp.T: contract last dims of both operands.
        s = lax.dot_general(qh, kh, (((1,), (1,)), ((), ())),
                            preferred_element_type=jnp.float32)   # (TQ, Lkv)

        # Numerically-stable softmax; normalisation deferred to the (TQ, d)
        # head output and done with the EUP approximate reciprocal.
        m = jnp.max(s, axis=-1, keepdims=True)
        p = jnp.exp(s - m)
        denom = jnp.sum(p, axis=-1, keepdims=True)

        o = jnp.dot(p.astype(in_dtype), vh, preferred_element_type=jnp.float32)  # (TQ, d)
        o = o * pl.reciprocal(denom, approx=True)

        # Folded per-head output projection (wph[h] @ wO slice) -> accumulate
        # straight into the lane-dense (TQ, E_pad) slab.
        acc = acc + jnp.dot(o.astype(in_dtype), wfold_ref[h],
                            preferred_element_type=jnp.float32)

    out_ref[0] = (acc + bfold_ref[...]).astype(out_ref.dtype)


def _block_diag(w):
    """(H, d, d) per-head weights -> (H*d, H*d) block-diagonal weight."""
    H, d, _ = w.shape
    out = jnp.zeros((H * d, H * d), w.dtype)
    for h in range(H):
        out = out.at[h * d:(h + 1) * d, h * d:(h + 1) * d].set(w[h])
    return out


def multi_head_cross_attention(query, key_value, params, *, q_tile=256,
                               compute_dtype=None):
    """Pallas forward pass for the PyTorch MultiHeadCrossAttention module.

    params = (wq, bq, wk, bk, wv, bv, wph, bph, wO, bO): per-head weights stacked
    as (H, d, d), per-head biases (H, 1, d), W_O (E, E), bO (1, E).

    compute_dtype: pass jnp.bfloat16 on v6e/v7x to run the matmuls in bf16
    (accumulation and softmax stay in f32 inside the kernel).
    """
    (wq, bq, wk, bk, wv, bv, wph, bph, wO, bO) = params
    B, Lq, E = query.shape
    _, Lkv, _ = key_value.shape
    H, d, _ = wq.shape
    assert H * d == E, "embedding_dim must equal num_heads * head_dim"

    out_dtype = jnp.float32

    # ---- wrapper-side weight folding (tiny one-off XLA ops) ----------------------
    # out = cat_h(o_h @ wph[h] + bph[h]) @ wO + bO
    #     = sum_h o_h @ (wph[h] @ wO[h*d:(h+1)*d]) + (cat_h bph[h]) @ wO + bO
    wO_split = wO.reshape(H, d, E)
    wfold = jnp.einsum('hij,hjk->hik', wph, wO_split)     # (H, d, E)
    bfold = bph.reshape(1, E) @ wO + bO                   # (1, E)

    # Pad the output lane dim to a multiple of 128 so in-kernel stores are
    # unmasked; the padding columns are exact zeros and are sliced off below.
    E_pad = ((E + 127) // 128) * 128
    if E_pad != E:
        wfold = jnp.pad(wfold, ((0, 0), (0, 0), (0, E_pad - E)))
        bfold = jnp.pad(bfold, ((0, 0), (0, E_pad - E)))

    # Full-width block-diagonal Q/K/V projection weights + flat biases.
    wq_blk, wk_blk, wv_blk = _block_diag(wq), _block_diag(wk), _block_diag(wv)
    bq_f, bk_f, bv_f = (b.reshape(1, E) for b in (bq, bk, bv))

    if compute_dtype is not None:
        cast = lambda x: x.astype(compute_dtype)
        query, key_value = cast(query), cast(key_value)
        wq_blk, wk_blk, wv_blk = cast(wq_blk), cast(wk_blk), cast(wv_blk)
        bq_f, bk_f, bv_f = cast(bq_f), cast(bk_f), cast(bv_f)
        wfold, bfold = cast(wfold), cast(bfold)
    kv_scratch_dtype = key_value.dtype

    # ---- grid / tiling -----------------------------------------------------------
    # Tile Lq so per-step VMEM stays bounded and the software pipeline has real
    # overlap; batch axis is "parallel" (megacore), Q-tile axis is "arbitrary"
    # because it carries the K/V-projection scratch state.
    TQ = q_tile if (Lq % q_tile == 0) else Lq
    num_q_tiles = Lq // TQ

    def resident(shape):               # whole-array block, constant index -> fetched once
        zeros = (0,) * len(shape)
        return pl.BlockSpec(shape, lambda b, qi, _z=zeros: _z)

    grid_spec = pltpu.PrefetchScalarGridSpec(
        num_scalar_prefetch=0,
        grid=(B, num_q_tiles),
        in_specs=[
            pl.BlockSpec((1, TQ, E), lambda b, qi: (b, qi, 0)),    # Q tile
            pl.BlockSpec((1, Lkv, E), lambda b, qi: (b, 0, 0)),    # full K/V (cross-attn)
            resident(wq_blk.shape), resident(bq_f.shape),
            resident(wk_blk.shape), resident(bk_f.shape),
            resident(wv_blk.shape), resident(bv_f.shape),
            resident(wfold.shape), resident(bfold.shape),
        ],
        out_specs=pl.BlockSpec((1, TQ, E_pad), lambda b, qi: (b, qi, 0)),
        scratch_shapes=[
            pltpu.VMEM((Lkv, E), kv_scratch_dtype),   # projected K (persists across Q tiles)
            pltpu.VMEM((Lkv, E), kv_scratch_dtype),   # projected V
        ],
    )

    # TODO(synk): at production shapes set vmem_limit_bytes per generation (v7x
    # has 64 MiB VMEM/core vs 128 MiB on v5e/v6e) and tile Lkv if it grows large.
    out = pl.pallas_call(
        mhca_kernel,
        out_shape=jax.ShapeDtypeStruct((B, Lq, E_pad), out_dtype),
        grid_spec=grid_spec,
        compiler_params=pltpu.CompilerParams(
            dimension_semantics=("parallel", "arbitrary")),
    )(query, key_value, wq_blk, bq_f, wk_blk, bk_f, wv_blk, bv_f, wfold, bfold)

    if E_pad != E:
        out = out[..., :E]
    return out


def reference(query, key_value, params):
    """Pure-JAX reference (exact math of the assumed PyTorch module)."""
    (wq, bq, wk, bk, wv, bv, wph, bph, wO, bO) = params
    H, d, _ = wq.shape
    scale = 1.0 / math.sqrt(d)
    heads = []
    for h in range(H):
        qh = query[:, :, h * d:(h + 1) * d]
        kvh = key_value[:, :, h * d:(h + 1) * d]
        qp = qh @ wq[h] + bq[h]
        kp = kvh @ wk[h] + bk[h]
        vp = kvh @ wv[h] + bv[h]
        s = jnp.einsum('bqd,bkd->bqk', qp, kp) * scale
        p = jax.nn.softmax(s, axis=-1)
        o = jnp.einsum('bqk,bkd->bqd', p, vp)
        heads.append(o @ wph[h] + bph[h])
    cat = jnp.concatenate(heads, axis=-1)
    return cat @ wO + bO


if __name__ == "__main__":
    B, Lq, Lkv, E, H = 2, 8, 16, 32, 4
    d = E // H

    root = jax.random.PRNGKey(0)
    keys = jax.random.split(root, 10)

    def xavier(k, shape):
        fan_in, fan_out = shape[-2], shape[-1]
        lim = math.sqrt(6.0 / (fan_in + fan_out))
        return jax.random.uniform(k, shape, jnp.float32, -lim, lim)

    query = jax.random.normal(keys[0], (B, Lq, E), jnp.float32)
    key_value = jax.random.normal(keys[1], (B, Lkv, E), jnp.float32)

    # Per-head projections (H, d, d), biases (H, 1, d); final W_O (E, E), bias (1, E)
    wq = xavier(keys[2], (H, d, d));  bq = jnp.zeros((H, 1, d), jnp.float32)
    wk = xavier(keys[3], (H, d, d));  bk = jnp.zeros((H, 1, d), jnp.float32)
    wv = xavier(keys[4], (H, d, d));  bv = jnp.zeros((H, 1, d), jnp.float32)
    wph = xavier(keys[5], (H, d, d)); bph = jnp.zeros((H, 1, d), jnp.float32)
    wO = xavier(keys[6], (E, E));     bO = jnp.zeros((1, E), jnp.float32)

    params = (wq, bq, wk, bk, wv, bv, wph, bph, wO, bO)

    out = multi_head_cross_attention(query, key_value, params)
    out = jax.block_until_ready(out)

    ref = reference(query, key_value, params)
    assert out.shape == (B, Lq, E)
    # Tolerance accounts for the EUP approximate reciprocal in the softmax
    # normalisation (~2^-12 relative) and the wph@W_O fold reassociation.
    assert jnp.allclose(out, ref, atol=5e-3, rtol=5e-3), "mismatch vs JAX reference"

    print("KERNEL_OK")
</pallas_src>

<mosaic_0001>
module attributes {stable_mosaic.version = 11 : i64} {
  func.func @mhca_kernel(%arg0: i32, %arg1: i32, %arg2: memref<1x8x32xf32, #tpu.memory_space<vmem>>, %arg3: memref<1x16x32xf32, #tpu.memory_space<vmem>>, %arg4: memref<32x32xf32, #tpu.memory_space<vmem>>, %arg5: memref<1x32xf32, #tpu.memory_space<vmem>>, %arg6: memref<32x32xf32, #tpu.memory_space<vmem>>, %arg7: memref<1x32xf32, #tpu.memory_space<vmem>>, %arg8: memref<32x32xf32, #tpu.memory_space<vmem>>, %arg9: memref<1x32xf32, #tpu.memory_space<vmem>>, %arg10: memref<4x8x128xf32, #tpu.memory_space<vmem>>, %arg11: memref<1x128xf32, #tpu.memory_space<vmem>>, %arg12: memref<1x8x128xf32, #tpu.memory_space<vmem>>, %arg13: memref<16x32xf32, #tpu.memory_space<vmem>>, %arg14: memref<16x32xf32, #tpu.memory_space<vmem>>) attributes {dimension_semantics = [#tpu.dimension_semantics<parallel>, #tpu.dimension_semantics<arbitrary>], iteration_bounds = array<i64: 2, 1>, scalar_prefetch = 0 : i64, scratch_operands = 2 : i64, tpu.core_type = #tpu.core_type<tc>, window_params = [{transform_indices = @transform_0, window_bounds = array<i64: 1, 8, 32>}, {transform_indices = @transform_1, window_bounds = array<i64: 1, 16, 32>}, {pipeline_mode = #tpu.pipeline_mode<synchronous>, transform_indices = @transform_2, window_bounds = array<i64: 32, 32>}, {pipeline_mode = #tpu.pipeline_mode<synchronous>, transform_indices = @transform_3, window_bounds = array<i64: 1, 32>}, {pipeline_mode = #tpu.pipeline_mode<synchronous>, transform_indices = @transform_4, window_bounds = array<i64: 32, 32>}, {pipeline_mode = #tpu.pipeline_mode<synchronous>, transform_indices = @transform_5, window_bounds = array<i64: 1, 32>}, {pipeline_mode = #tpu.pipeline_mode<synchronous>, transform_indices = @transform_6, window_bounds = array<i64: 32, 32>}, {pipeline_mode = #tpu.pipeline_mode<synchronous>, transform_indices = @transform_7, window_bounds = array<i64: 1, 32>}, {pipeline_mode = #tpu.pipeline_mode<synchronous>, transform_indices = @transform_8, window_bounds = array<i64: 4, 8, 128>}, {pipeline_mode = #tpu.pipeline_mode<synchronous>, transform_indices = @transform_9, window_bounds = array<i64: 1, 128>}, {transform_indices = @transform_10, window_bounds = array<i64: 1, 8, 128>}]} {
    %c0 = arith.constant 0 : index
    %c0_0 = arith.constant 0 : index
    %c0_1 = arith.constant 0 : index
    %0 = vector.load %arg2[%c0, %c0_0, %c0_1] : memref<1x8x32xf32, #tpu.memory_space<vmem>>, vector<1x8x32xf32>
    %1 = vector.shape_cast %0 : vector<1x8x32xf32> to vector<8x32xf32>
    %c0_i32 = arith.constant 0 : i32
    %2 = arith.cmpi eq, %arg1, %c0_i32 : i32
    %3 = arith.extui %2 : i1 to i32
    %c0_i32_2 = arith.constant 0 : i32
    %4 = arith.cmpi ne, %3, %c0_i32_2 : i32
    scf.if %4 {
      %c0_47 = arith.constant 0 : index
      %c0_48 = arith.constant 0 : index
      %c0_49 = arith.constant 0 : index
      %97 = vector.load %arg3[%c0_47, %c0_48, %c0_49] : memref<1x16x32xf32, #tpu.memory_space<vmem>>, vector<1x16x32xf32>
      %98 = vector.shape_cast %97 : vector<1x16x32xf32> to vector<16x32xf32>
      %c0_50 = arith.constant 0 : index
      %c0_51 = arith.constant 0 : index
      %99 = vector.load %arg6[%c0_50, %c0_51] : memref<32x32xf32, #tpu.memory_space<vmem>>, vector<32x32xf32>
      %cst_52 = arith.constant dense<0.000000e+00> : vector<16x32xf32>
      %100 = tpu.matmul %98, %99, %cst_52 {dimension_numbers = #tpu.dot_dimension_numbers<[1], [0], [0], [1], [0, 0, 1, 1], [], []>} : vector<16x32xf32>, vector<32x32xf32>, vector<16x32xf32> -> vector<16x32xf32>
      %c0_53 = arith.constant 0 : index
      %c0_54 = arith.constant 0 : index
      %101 = vector.load %arg7[%c0_53, %c0_54] : memref<1x32xf32, #tpu.memory_space<vmem>>, vector<1x32xf32>
      %102 = vector.broadcast %101 : vector<1x32xf32> to vector<16x32xf32>
      %103 = arith.addf %100, %102 : vector<16x32xf32>
      %c0_55 = arith.constant 0 : index
      %c0_56 = arith.constant 0 : index
      %104 = vector.load %arg13[%c0_55, %c0_56] : memref<16x32xf32, #tpu.memory_space<vmem>>, vector<16x32xf32>
      tpu.vector_store %arg13[%c0_55, %c0_56], %103 {strides = array<i32>} : memref<16x32xf32, #tpu.memory_space<vmem>>, vector<16x32xf32>,
      %c0_57 = arith.constant 0 : index
      %c0_58 = arith.constant 0 : index
      %105 = vector.load %arg8[%c0_57, %c0_58] : memref<32x32xf32, #tpu.memory_space<vmem>>, vector<32x32xf32>
      %cst_59 = arith.constant dense<0.000000e+00> : vector<16x32xf32>
      %106 = tpu.matmul %98, %105, %cst_59 {dimension_numbers = #tpu.dot_dimension_numbers<[1], [0], [0], [1], [0, 0, 1, 1], [], []>} : vector<16x32xf32>, vector<32x32xf32>, vector<16x32xf32> -> vector<16x32xf32>
      %c0_60 = arith.constant 0 : index
      %c0_61 = arith.constant 0 : index
      %107 = vector.load %arg9[%c0_60, %c0_61] : memref<1x32xf32, #tpu.memory_space<vmem>>, vector<1x32xf32>
      %108 = vector.broadcast %107 : vector<1x32xf32> to vector<16x32xf32>
      %109 = arith.addf %106, %108 : vector<16x32xf32>
      %c0_62 = arith.constant 0 : index
      %c0_63 = arith.constant 0 : index
      %110 = vector.load %arg14[%c0_62, %c0_63] : memref<16x32xf32, #tpu.memory_space<vmem>>, vector<16x32xf32>
      tpu.vector_store %arg14[%c0_62, %c0_63], %109 {strides = array<i32>} : memref<16x32xf32, #tpu.memory_space<vmem>>, vector<16x32xf32>,
    } else {
    }
    %c0_3 = arith.constant 0 : index
    %c0_4 = arith.constant 0 : index
    %5 = vector.load %arg4[%c0_3, %c0_4] : memref<32x32xf32, #tpu.memory_space<vmem>>, vector<32x32xf32>
    %cst = arith.constant dense<0.000000e+00> : vector<8x32xf32>
    %6 = tpu.matmul %1, %5, %cst {dimension_numbers = #tpu.dot_dimension_numbers<[1], [0], [0], [1], [0, 0, 1, 1], [], []>} : vector<8x32xf32>, vector<32x32xf32>, vector<8x32xf32> -> vector<8x32xf32>
    %c0_5 = arith.constant 0 : index
    %c0_6 = arith.constant 0 : index
    %7 = vector.load %arg5[%c0_5, %c0_6] : memref<1x32xf32, #tpu.memory_space<vmem>>, vector<1x32xf32>
    %8 = vector.broadcast %7 : vector<1x32xf32> to vector<8x32xf32>
    %9 = arith.addf %6, %8 : vector<8x32xf32>
    %cst_7 = arith.constant 0.353553385 : f32
    %10 = vector.broadcast %cst_7 : f32 to vector<8x32xf32>
    %11 = arith.mulf %9, %10 : vector<8x32xf32>
    %c0_8 = arith.constant 0 : index
    %c0_9 = arith.constant 0 : index
    %12 = vector.load %arg13[%c0_8, %c0_9] : memref<16x32xf32, #tpu.memory_space<vmem>>, vector<16x32xf32>
    %c0_10 = arith.constant 0 : index
    %c0_11 = arith.constant 0 : index
    %13 = vector.load %arg14[%c0_10, %c0_11] : memref<16x32xf32, #tpu.memory_space<vmem>>, vector<16x32xf32>
    %cst_12 = arith.constant 0.000000e+00 : f32
    %14 = vector.broadcast %cst_12 : f32 to vector<8x128xf32>
    %15 = vector.extract_strided_slice %11 {offsets = [0, 0], sizes = [8, 8], strides = [1, 1]} : vector<8x32xf32> to vector<8x8xf32>
    %16 = vector.extract_strided_slice %12 {offsets = [0, 0], sizes = [16, 8], strides = [1, 1]} : vector<16x32xf32> to vector<16x8xf32>
    %17 = vector.extract_strided_slice %13 {offsets = [0, 0], sizes = [16, 8], strides = [1, 1]} : vector<16x32xf32> to vector<16x8xf32>
    %cst_13 = arith.constant dense<0.000000e+00> : vector<8x16xf32>
    %18 = tpu.matmul %15, %16, %cst_13 {dimension_numbers = #tpu.dot_dimension_numbers<[1], [1], [0], [0], [0, 0, 1, 0], [], []>} : vector<8x8xf32>, vector<16x8xf32>, vector<8x16xf32> -> vector<8x16xf32>
    %cst_14 = arith.constant dense<0xFF800000> : vector<8xf32>
    %19 = vector.multi_reduction <maximumf>, %18, %cst_14 [1] : vector<8x16xf32> to vector<8xf32>
    %20 = vector.shape_cast %19 : vector<8xf32> to vector<8x1xf32>
    %21 = vector.broadcast %20 : vector<8x1xf32> to vector<8x16xf32>
    %22 = arith.subf %18, %21 : vector<8x16xf32>
    %23 = math.exp %22 : vector<8x16xf32>
    %cst_15 = arith.constant dense<0.000000e+00> : vector<8xf32>
    %24 = vector.multi_reduction <add>, %23, %cst_15 [1] : vector<8x16xf32> to vector<8xf32>
    %25 = vector.shape_cast %24 : vector<8xf32> to vector<8x1xf32>
    %cst_16 = arith.constant dense<0.000000e+00> : vector<8x8xf32>
    %26 = tpu.matmul %23, %17, %cst_16 {dimension_numbers = #tpu.dot_dimension_numbers<[1], [0], [0], [1], [0, 0, 1, 1], [], []>} : vector<8x16xf32>, vector<16x8xf32>, vector<8x8xf32> -> vector<8x8xf32>
    %27 = tpu.reciprocal %25 {approx = true} : vector<8x1xf32> -> vector<8x1xf32>
    %28 = vector.broadcast %27 : vector<8x1xf32> to vector<8x8xf32>
    %29 = arith.mulf %26, %28 : vector<8x8xf32>
    %c0_17 = arith.constant 0 : index
    %c0_18 = arith.constant 0 : index
    %c0_19 = arith.constant 0 : index
    %30 = vector.load %arg10[%c0_17, %c0_18, %c0_19] : memref<4x8x128xf32, #tpu.memory_space<vmem>>, vector<1x8x128xf32>
    %31 = vector.shape_cast %30 : vector<1x8x128xf32> to vector<8x128xf32>
    %cst_20 = arith.constant dense<0.000000e+00> : vector<8x128xf32>
    %32 = tpu.matmul %29, %31, %cst_20 {dimension_numbers = #tpu.dot_dimension_numbers<[1], [0], [0], [1], [0, 0, 1, 1], [], []>} : vector<8x8xf32>, vector<8x128xf32>, vector<8x128xf32> -> vector<8x128xf32>
    %33 = arith.addf %14, %32 : vector<8x128xf32>
    %34 = vector.extract_strided_slice %11 {offsets = [0, 8], sizes = [8, 8], strides = [1, 1]} : vector<8x32xf32> to vector<8x8xf32>
    %35 = vector.extract_strided_slice %12 {offsets = [0, 8], sizes = [16, 8], strides = [1, 1]} : vector<16x32xf32> to vector<16x8xf32>
    %36 = vector.extract_strided_slice %13 {offsets = [0, 8], sizes = [16, 8], strides = [1, 1]} : vector<16x32xf32> to vector<16x8xf32>
    %cst_21 = arith.constant dense<0.000000e+00> : vector<8x16xf32>
    %37 = tpu.matmul %34, %35, %cst_21 {dimension_numbers = #tpu.dot_dimension_numbers<[1], [1], [0], [0], [0, 0, 1, 0], [], []>} : vector<8x8xf32>, vector<16x8xf32>, vector<8x16xf32> -> vector<8x16xf32>
    %cst_22 = arith.constant dense<0xFF800000> : vector<8xf32>
    %38 = vector.multi_reduction <maximumf>, %37, %cst_22 [1] : vector<8x16xf32> to vector<8xf32>
    %39 = vector.shape_cast %38 : vector<8xf32> to vector<8x1xf32>
    %40 = vector.broadcast %39 : vector<8x1xf32> to vector<8x16xf32>
    %41 = arith.subf %37, %40 : vector<8x16xf32>
    %42 = math.exp %41 : vector<8x16xf32>
    %cst_23 = arith.constant dense<0.000000e+00> : vector<8xf32>
    %43 = vector.multi_reduction <add>, %42, %cst_23 [1] : vector<8x16xf32> to vector<8xf32>
    %44 = vector.shape_cast %43 : vector<8xf32> to vector<8x1xf32>
    %cst_24 = arith.constant dense<0.000000e+00> : vector<8x8xf32>
    %45 = tpu.matmul %42, %36, %cst_24 {dimension_numbers = #tpu.dot_dimension_numbers<[1], [0], [0], [1], [0, 0, 1, 1], [], []>} : vector<8x16xf32>, vector<16x8xf32>, vector<8x8xf32> -> vector<8x8xf32>
    %46 = tpu.reciprocal %44 {approx = true} : vector<8x1xf32> -> vector<8x1xf32>
    %47 = vector.broadcast %46 : vector<8x1xf32> to vector<8x8xf32>
    %48 = arith.mulf %45, %47 : vector<8x8xf32>
    %c1 = arith.constant 1 : index
    %c0_25 = arith.constant 0 : index
    %c0_26 = arith.constant 0 : index
    %49 = vector.load %arg10[%c1, %c0_25, %c0_26] : memref<4x8x128xf32, #tpu.memory_space<vmem>>, vector<1x8x128xf32>
    %50 = vector.shape_cast %49 : vector<1x8x128xf32> to vector<8x128xf32>
    %cst_27 = arith.constant dense<0.000000e+00> : vector<8x128xf32>
    %51 = tpu.matmul %48, %50, %cst_27 {dimension_numbers = #tpu.dot_dimension_numbers<[1], [0], [0], [1], [0, 0, 1, 1], [], []>} : vector<8x8xf32>, vector<8x128xf32>, vector<8x128xf32> -> vector<8x128xf32>
    %52 = arith.addf %33, %51 : vector<8x128xf32>
    %53 = vector.extract_strided_slice %11 {offsets = [0, 16], sizes = [8, 8], strides = [1, 1]} : vector<8x32xf32> to vector<8x8xf32>
    %54 = vector.extract_strided_slice %12 {offsets = [0, 16], sizes = [16, 8], strides = [1, 1]} : vector<16x32xf32> to vector<16x8xf32>
    %55 = vector.extract_strided_slice %13 {offsets = [0, 16], sizes = [16, 8], strides = [1, 1]} : vector<16x32xf32> to vector<16x8xf32>
    %cst_28 = arith.constant dense<0.000000e+00> : vector<8x16xf32>
    %56 = tpu.matmul %53, %54, %cst_28 {dimension_numbers = #tpu.dot_dimension_numbers<[1], [1], [0], [0], [0, 0, 1, 0], [], []>} : vector<8x8xf32>, vector<16x8xf32>, vector<8x16xf32> -> vector<8x16xf32>
    %cst_29 = arith.constant dense<0xFF800000> : vector<8xf32>
    %57 = vector.multi_reduction <maximumf>, %56, %cst_29 [1] : vector<8x16xf32> to vector<8xf32>
    %58 = vector.shape_cast %57 : vector<8xf32> to vector<8x1xf32>
    %59 = vector.broadcast %58 : vector<8x1xf32> to vector<8x16xf32>
    %60 = arith.subf %56, %59 : vector<8x16xf32>
    %61 = math.exp %60 : vector<8x16xf32>
    %cst_30 = arith.constant dense<0.000000e+00> : vector<8xf32>
    %62 = vector.multi_reduction <add>, %61, %cst_30 [1] : vector<8x16xf32> to vector<8xf32>
    %63 = vector.shape_cast %62 : vector<8xf32> to vector<8x1xf32>
    %cst_31 = arith.constant dense<0.000000e+00> : vector<8x8xf32>
    %64 = tpu.matmul %61, %55, %cst_31 {dimension_numbers = #tpu.dot_dimension_numbers<[1], [0], [0], [1], [0, 0, 1, 1], [], []>} : vector<8x16xf32>, vector<16x8xf32>, vector<8x8xf32> -> vector<8x8xf32>
    %65 = tpu.reciprocal %63 {approx = true} : vector<8x1xf32> -> vector<8x1xf32>
    %66 = vector.broadcast %65 : vector<8x1xf32> to vector<8x8xf32>
    %67 = arith.mulf %64, %66 : vector<8x8xf32>
    %c2 = arith.constant 2 : index
    %c0_32 = arith.constant 0 : index
    %c0_33 = arith.constant 0 : index
    %68 = vector.load %arg10[%c2, %c0_32, %c0_33] : memref<4x8x128xf32, #tpu.memory_space<vmem>>, vector<1x8x128xf32>
    %69 = vector.shape_cast %68 : vector<1x8x128xf32> to vector<8x128xf32>
    %cst_34 = arith.constant dense<0.000000e+00> : vector<8x128xf32>
    %70 = tpu.matmul %67, %69, %cst_34 {dimension_numbers = #tpu.dot_dimension_numbers<[1], [0], [0], [1], [0, 0, 1, 1], [], []>} : vector<8x8xf32>, vector<8x128xf32>, vector<8x128xf32> -> vector<8x128xf32>
    %71 = arith.addf %52, %70 : vector<8x128xf32>
    %72 = vector.extract_strided_slice %11 {offsets = [0, 24], sizes = [8, 8], strides = [1, 1]} : vector<8x32xf32> to vector<8x8xf32>
    %73 = vector.extract_strided_slice %12 {offsets = [0, 24], sizes = [16, 8], strides = [1, 1]} : vector<16x32xf32> to vector<16x8xf32>
    %74 = vector.extract_strided_slice %13 {offsets = [0, 24], sizes = [16, 8], strides = [1, 1]} : vector<16x32xf32> to vector<16x8xf32>
    %cst_35 = arith.constant dense<0.000000e+00> : vector<8x16xf32>
    %75 = tpu.matmul %72, %73, %cst_35 {dimension_numbers = #tpu.dot_dimension_numbers<[1], [1], [0], [0], [0, 0, 1, 0], [], []>} : vector<8x8xf32>, vector<16x8xf32>, vector<8x16xf32> -> vector<8x16xf32>
    %cst_36 = arith.constant dense<0xFF800000> : vector<8xf32>
    %76 = vector.multi_reduction <maximumf>, %75, %cst_36 [1] : vector<8x16xf32> to vector<8xf32>
    %77 = vector.shape_cast %76 : vector<8xf32> to vector<8x1xf32>
    %78 = vector.broadcast %77 : vector<8x1xf32> to vector<8x16xf32>
    %79 = arith.subf %75, %78 : vector<8x16xf32>
    %80 = math.exp %79 : vector<8x16xf32>
    %cst_37 = arith.constant dense<0.000000e+00> : vector<8xf32>
    %81 = vector.multi_reduction <add>, %80, %cst_37 [1] : vector<8x16xf32> to vector<8xf32>
    %82 = vector.shape_cast %81 : vector<8xf32> to vector<8x1xf32>
    %cst_38 = arith.constant dense<0.000000e+00> : vector<8x8xf32>
    %83 = tpu.matmul %80, %74, %cst_38 {dimension_numbers = #tpu.dot_dimension_numbers<[1], [0], [0], [1], [0, 0, 1, 1], [], []>} : vector<8x16xf32>, vector<16x8xf32>, vector<8x8xf32> -> vector<8x8xf32>
    %84 = tpu.reciprocal %82 {approx = true} : vector<8x1xf32> -> vector<8x1xf32>
    %85 = vector.broadcast %84 : vector<8x1xf32> to vector<8x8xf32>
    %86 = arith.mulf %83, %85 : vector<8x8xf32>
    %c3 = arith.constant 3 : index
    %c0_39 = arith.constant 0 : index
    %c0_40 = arith.constant 0 : index
    %87 = vector.load %arg10[%c3, %c0_39, %c0_40] : memref<4x8x128xf32, #tpu.memory_space<vmem>>, vector<1x8x128xf32>
    %88 = vector.shape_cast %87 : vector<1x8x128xf32> to vector<8x128xf32>
    %cst_41 = arith.constant dense<0.000000e+00> : vector<8x128xf32>
    %89 = tpu.matmul %86, %88, %cst_41 {dimension_numbers = #tpu.dot_dimension_numbers<[1], [0], [0], [1], [0, 0, 1, 1], [], []>} : vector<8x8xf32>, vector<8x128xf32>, vector<8x128xf32> -> vector<8x128xf32>
    %90 = arith.addf %71, %89 : vector<8x128xf32>
    %c0_42 = arith.constant 0 : index
    %c0_43 = arith.constant 0 : index
    %91 = vector.load %arg11[%c0_42, %c0_43] : memref<1x128xf32, #tpu.memory_space<vmem>>, vector<1x128xf32>
    %92 = vector.broadcast %91 : vector<1x128xf32> to vector<8x128xf32>
    %93 = arith.addf %90, %92 : vector<8x128xf32>
    %c0_44 = arith.constant 0 : index
    %c0_45 = arith.constant 0 : index
    %c0_46 = arith.constant 0 : index
    %94 = vector.load %arg12[%c0_44, %c0_45, %c0_46] : memref<1x8x128xf32, #tpu.memory_space<vmem>>, vector<1x8x128xf32>
    %95 = vector.shape_cast %94 : vector<1x8x128xf32> to vector<8x128xf32>
    %96 = vector.shape_cast %93 : vector<8x128xf32> to vector<1x8x128xf32>
    tpu.vector_store %arg12[%c0_44, %c0_45, %c0_46], %96 {strides = array<i32>} : memref<1x8x128xf32, #tpu.memory_space<vmem>>, vector<1x8x128xf32>,
    return
  }
  func.func @transform_0(%arg0: i32, %arg1: i32) -> (i32, i32, i32) {
    %c0_i32 = arith.constant 0 : i32
    %c0_i32_0 = arith.constant 0 : i32
    return %arg0, %arg1, %c0_i32 : i32, i32, i32
  }
  func.func @transform_1(%arg0: i32, %arg1: i32) -> (i32, i32, i32) {
    %c0_i32 = arith.constant 0 : i32
    %c0_i32_0 = arith.constant 0 : i32
    %c0_i32_1 = arith.constant 0 : i32
    return %arg0, %c0_i32, %c0_i32_0 : i32, i32, i32
  }
  func.func @transform_2(%arg0: i32, %arg1: i32) -> (i32, i32) {
    %c0_i32 = arith.constant 0 : i32
    %c0_i32_0 = arith.constant 0 : i32
    %c0_i32_1 = arith.constant 0 : i32
    return %c0_i32, %c0_i32_0 : i32, i32
  }
  func.func @transform_3(%arg0: i32, %arg1: i32) -> (i32, i32) {
    %c0_i32 = arith.constant 0 : i32
    %c0_i32_0 = arith.constant 0 : i32
    %c0_i32_1 = arith.constant 0 : i32
    return %c0_i32, %c0_i32_0 : i32, i32
  }
  func.func @transform_4(%arg0: i32, %arg1: i32) -> (i32, i32) {
    %c0_i32 = arith.constant 0 : i32
    %c0_i32_0 = arith.constant 0 : i32
    %c0_i32_1 = arith.constant 0 : i32
    return %c0_i32, %c0_i32_0 : i32, i32
  }
  func.func @transform_5(%arg0: i32, %arg1: i32) -> (i32, i32) {
    %c0_i32 = arith.constant 0 : i32
    %c0_i32_0 = arith.constant 0 : i32
    %c0_i32_1 = arith.constant 0 : i32
    return %c0_i32, %c0_i32_0 : i32, i32
  }
  func.func @transform_6(%arg0: i32, %arg1: i32) -> (i32, i32) {
    %c0_i32 = arith.constant 0 : i32
    %c0_i32_0 = arith.constant 0 : i32
    %c0_i32_1 = arith.constant 0 : i32
    return %c0_i32, %c0_i32_0 : i32, i32
  }
  func.func @transform_7(%arg0: i32, %arg1: i32) -> (i32, i32) {
    %c0_i32 = arith.constant 0 : i32
    %c0_i32_0 = arith.constant 0 : i32
    %c0_i32_1 = arith.constant 0 : i32
    return %c0_i32, %c0_i32_0 : i32, i32
  }
  func.func @transform_8(%arg0: i32, %arg1: i32) -> (i32, i32, i32) {
    %c0_i32 = arith.constant 0 : i32
    %c0_i32_0 = arith.constant 0 : i32
    %c0_i32_1 = arith.constant 0 : i32
    %c0_i32_2 = arith.constant 0 : i32
    return %c0_i32, %c0_i32_0, %c0_i32_1 : i32, i32, i32
  }
  func.func @transform_9(%arg0: i32, %arg1: i32) -> (i32, i32) {
    %c0_i32 = arith.constant 0 : i32
    %c0_i32_0 = arith.constant 0 : i32
    %c0_i32_1 = arith.constant 0 : i32
    return %c0_i32, %c0_i32_0 : i32, i32
  }
  func.func @transform_10(%arg0: i32, %arg1: i32) -> (i32, i32, i32) {
    %c0_i32 = arith.constant 0 : i32
    %c0_i32_0 = arith.constant 0 : i32
    return %arg0, %arg1, %c0_i32 : i32, i32, i32
  }
}

</mosaic_0001>

<bundles_post_ra>
// kernel: tpu_custom_call.1
= control target key start
LH: loop header
LB: loop body
LE: loop exit
PB: predicated region body
PF: predicated region fallthrough
CT: control target
= control target key end

     0   :  { %s2953_s0 = inlined_call_operand.hbm [shape: f32[2,8,32], index: 0, kind: input, shape index: {}]   ;;  %s2954_s1 = inlined_call_operand.hbm [shape: f32[2,16,32], index: 1, kind: input, shape index: {}]   ;;  %s2955_s2 = inlined_call_operand.hbm [shape: f32[32,32], index: 2, kind: input, shape index: {}]   ;;  %s2956_s3 = inlined_call_operand.vmem [shape: f32[1,32], index: 3, kind: input, shape index: {}]   ;;  %s2957_s4 = inlined_call_operand.hbm [shape: f32[32,32], index: 4, kind: input, shape index: {}]   ;;  %s2958_s5 = inlined_call_operand.vmem [shape: f32[1,32], index: 5, kind: input, shape index: {}]   ;;  %s2959_s6 = inlined_call_operand.hbm [shape: f32[32,32], index: 6, kind: input, shape index: {}]   ;;  %s2960_s7 = inlined_call_operand.vmem [shape: f32[1,32], index: 7, kind: input, shape index: {}]   ;;  %s2961_s8 = inlined_call_operand.hbm [shape: f32[4,8,128], index: 8, kind: input, shape index: {}]   ;;  %s2962_s9 = inlined_call_operand.vmem [shape: f32[1,128], index: 9, kind: input, shape index: {}]   ;;  %s2963_s10 = inlined_call_operand.hbm [shape: f32[2,8,128], index: 10, kind: output, shape index: {}]  }
   0x1   :  { %2969 = sst [smem:[#allocation26_spill]] %s2953_s0 }
   0x2   :  { %2970 = sst [smem:[#allocation27_spill]] %s2955_s2 }
   0x3   :  { %2971 = sst [smem:[#allocation28_spill]] %s2957_s4 }
   0x4   :  { %2972 = sst [smem:[#allocation29_spill]] %s2959_s6 }
   0x5   :  { %2973 = sst [smem:[#allocation30_spill]] %s2961_s8 }
   0x6   :  { %15 = vsyncpa [#allocation5], 0 }
   0x7   :  { %17 = vsyncpa [#allocation5 + $0x1], 0 }
   0x8   :  { %18 = vsyncpa [#allocation8], 0 }
   0x9   :  { %20 = vsyncpa [#allocation8 + $0x1], 0 }
   0xa   :  { %21 = vsyncpa [#allocation11], 0 }
   0xb   :  { %22 = vsyncpa [#allocation14], 0 }
   0xc   :  { %23 = vsyncpa [#allocation6], 0 }
   0xd   :  { %25 = vsyncpa [#allocation6 + $0x1], 0  ;;  %s2590_s13 = smov 0   ;;  %s2592_s14 = smov 0  }
   0xe   :  { %s2594_s15 = smov 0   ;;  %s2596_s16 = smov 0  }
   0xf   :  { %s2598_s17 = smov 0   ;;  %s2600_s18 = smov 0  }
  0x10 LB: > { %2974 = sst [smem:[#allocation22_spill]] %s2507_s15  ;;  %s2621_s19 = sadd.s32 4294967295, %s2519_s18   ;;  %s2519_s18 = sphi %s2600_s18, %s31_s18   ;;  %s2515_s17 = sphi %s2598_s17, %s3000_s17   ;;  %s2511_s16 = sphi %s2596_s16, %s2999_s16   ;;  %s2507_s15 = sphi %s2594_s15, %s2995_s15   ;;  %s2503_s14 = sphi %s2592_s14, %s2998_s14   ;;  %s2499_s13 = sphi %s2590_s13, %s2997_s13  }
  0x11   : > { %p1921_p0 = scmp.ge.s32.totalorder %s2519_s18, 1  ;;  %p66_p1 = scmp.eq.s32.totalorder %s2621_s19, 0 }
  0x12   : > { %p298_p2 = scmp.lt.s32.totalorder %s2519_s18, 3  ;;  %s2521_s21 = smov [#allocation9]  }
  0x13   : > { %s310_s22 = sshll.u32 %s2521_s21, 4  ;;  %s2522_s24 = smov [#allocation10]   ;;  %s311_s22 = int_to_ptr.vmem [resolvable:$true] %s310_s22 }
  0x14   : > { %p2626_p3 = pnand %p1921_p0, %p298_p2  ;;  %s326_s25 = sshll.u32 %s2522_s24, 4  ;;  %s327_s25 = int_to_ptr.vmem [resolvable:$true] %s326_s25 }
  0x15   : > { %s2523_s26 = smov [#allocation12]   ;;  %s2274_s28 = scalar_lea.vmem %s311_s22, 512 }
  0x16   : > { %p2154_p4 = pneg %p2626_p3  ;;  %s342_s27 = sshll.u32 %s2523_s26, 4  ;;  %s343_s27 = int_to_ptr.vmem [resolvable:$true] %s342_s27 }
  0x17   : > { %p2275_p8 = scmp.ne.s32.totalorder %s311_s22, %s2274_s28  ;;  %p2282_p11 = scmp.lt.s32.totalorder %s311_s22, %s311_s22 }
  0x18   : > { %p2635_p6 = pnand %p2154_p4, %p66_p1  ;;  %p2283_p12 = scmp.lt.s32.totalorder %s2274_s28, %s2274_s28 }
  0x1a   : > { %p2265_p7 = pneg %p2635_p6  ;;  %p2284_p13 = por %p2283_p12, %p2282_p11 }
  0x1c   : > { %p2277_p9 = pnand %p2275_p8, %p2265_p7 }
  0x1e   : > { %p2278_p10 = pneg %p2277_p9 }
  0x20   : > { %p2285_p0 = pnand %p2284_p13, %p2278_p10 }
  0x22   : > { %2288 = shalt.err (!%p2285_p0)
}
  0x23   : > { %s2964_s29 = smov 128   ;;  %s2965_s30 = smov 8  }
  0x24   : > { %s2977_s2 = sld [smem:[#allocation27_spill]]  ;;  %s2300_s21 = scalar_lea.vmem %s327_s25, 512 }
  0x25   : > { %p2301_p2 = scmp.ne.s32.totalorder %s327_s25, %s2300_s21  ;;  %p2308_p9 = scmp.lt.s32.totalorder %s327_s25, %s327_s25 }
  0x26   : > { %p2309_p10 = scmp.lt.s32.totalorder %s2300_s21, %s2300_s21 }
  0x27   : > { %p2303_p4 = pnand %p2301_p2, %p2265_p7 }
  0x28   : > { %p2310_p11 = por %p2309_p10, %p2308_p9 }
  0x29   : > { %p2304_p8 = pneg %p2303_p4 }
  0x2a   : > { %2157 = dma.hbm_to_vmem [thread:$0]  (!%p2635_p6), %s2977_s2, 512, %s311_s22, [#allocation8], %s2964_s29, %s2964_s29, %s2965_s30  }
  0x2b   : > { %p2311_p12 = pnand %p2310_p11, %p2304_p8 }
  0x2d   : > { %2314 = shalt.err (!%p2311_p12)
}
  0x2e   : > { %s2978_s4 = sld [smem:[#allocation28_spill]]  ;;  %s2326_s22 = scalar_lea.vmem %s343_s27, 512 }
  0x2f   : > { %p2327_p13 = scmp.ne.s32.totalorder %s343_s27, %s2326_s22  ;;  %p2334_p4 = scmp.lt.s32.totalorder %s343_s27, %s343_s27 }
  0x30   : > { %p2335_p8 = scmp.lt.s32.totalorder %s2326_s22, %s2326_s22 }
  0x31   : > { %p2329_p0 = pnand %p2327_p13, %p2265_p7 }
  0x32   : > { %p2336_p9 = por %p2335_p8, %p2334_p4 }
  0x33   : > { %p2330_p2 = pneg %p2329_p0 }
  0x34   : > { %2160 = dma.hbm_to_vmem [thread:$0]  (!%p2635_p6), %s2978_s4, 512, %s327_s25, [#allocation11], %s2964_s29, %s2964_s29, %s2965_s30  }
  0x35   : > { %p2337_p10 = pnand %p2336_p9, %p2330_p2 }
  0x37   : > { %2340 = shalt.err (!%p2337_p10)
}
  0x38   : > { %s2979_s6 = sld [smem:[#allocation29_spill]]  ;;  %s2526_s25 = smov [#allocation13]  }
  0x39   : > { %s358_s12 = sshll.u32 %s2526_s25, 4  ;;  %s359_s12 = int_to_ptr.vmem [resolvable:$true] %s358_s12 }
  0x3a   : > { %s2352_s21 = scalar_lea.vmem %s359_s12, 512  ;;  %p2360_p0 = scmp.lt.s32.totalorder %s359_s12, %s359_s12 }
  0x3b   : > { %p2353_p11 = scmp.ne.s32.totalorder %s359_s12, %s2352_s21  ;;  %p2361_p2 = scmp.lt.s32.totalorder %s2352_s21, %s2352_s21 }
  0x3d   : > { %p2355_p12 = pnand %p2353_p11, %p2265_p7  ;;  %p2362_p4 = por %p2361_p2, %p2360_p0 }
  0x3e   : > { %2163 = dma.hbm_to_vmem [thread:$0]  (!%p2635_p6), %s2979_s6, 512, %s343_s27, [#allocation11], %s2964_s29, %s2964_s29, %s2965_s30  }
  0x3f   : > { %p2356_p13 = pneg %p2355_p12 }
  0x41   : > { %p2363_p8 = pnand %p2362_p4, %p2356_p13 }
  0x43   : > { %2366 = shalt.err (!%p2363_p8)
}
  0x44   : > { %s2980_s8 = sld [smem:[#allocation30_spill]]  ;;  %s1920_s23 = sadd.s32 4294967294, %s2519_s18  }
  0x45   : > { %s43_s26 = sadd.s32 1, %s2515_s17  ;;  %s52_s22 = sadd.s32 1, %s2507_s15 }
  0x46   : > { %p45_p7 = scmp.ge.s32.totalorder %s43_s26, 2  ;;  %p59_p9 = scmp.ne.s32.totalorder %s2507_s15, %s2503_s14 }
  0x47   : > { %p60_p10 = scmp.eq.s32.totalorder %s2519_s18, 0  ;;  %p65_p12 = scmp.ne.s32.totalorder %s2503_s14, %s2499_s13 }
  0x48   : > { %s3002_s26 = smov (%p45_p7, %s43_s26), 0  ;;  %p291_p4 = scmp.eq.s32.totalorder %s1920_s23, 1 }
  0x49   : > { %2981 = sst [smem:[#allocation23_spill]] %s3002_s26  ;;  %p2693_p11 = por %p60_p10, %p59_p9 }
  0x4a   : > { %2166 = dma.hbm_to_vmem [thread:$0]  (!%p2635_p6), %s2980_s8, 512, %s359_s12, [#allocation14], %s2964_s29, %s2964_s29, %s2965_s30  }
  0x4b   : > { %s47_s11 = ssub.s32 %s2515_s17, %s3002_s26  ;;  %p285_p6 = scmp.eq.s32.totalorder %s2621_s19, 1 }
  0x4c   : > { %p50_p13 = scmp.eq.s32.totalorder %s47_s11, 0  ;;  %p2704_p0 = por %p66_p1, %p65_p12 }
  0x4d   : > { %p2708_p2 = por %p285_p6, %p59_p9  ;;  %p2715_p8 = por %p291_p4, %p65_p12 }
  0x4e   : > { %s2713_s21 = scalar_select %p50_p13, %s2507_s15, %s52_s22  }
  0x4f   : > { %s2986_s27 = scalar_select %p2715_p8, 1, 0 }
  0x50   : > { %2985 = sst [smem:[#allocation24_spill]] %s2713_s21  ;;  %p2182_p7 = scmp.lt.s32.totalorder %s2519_s18, 2 }
  0x51   : > { %2987 = sst [smem:[#allocation25_spill]] %s2986_s27  ;;  %s375_s24 = sand.u32 1, %s2507_s15  }
  0x52   : > { %s1928_s29 = sshll.u32 %s2515_s17, 7  ;;  %s1927_s11 = sshll.u32 %s375_s24, 3 }
  0x53   : > { %s2988_s0 = sld [smem:[#allocation26_spill]]  ;;  %s379_s6 = scalar_lea.vmem [#allocation4], %s1927_s11 }
  0x54   : > { %s387_s8 = sshll.u32 %s379_s6, 4  ;;  %p2727_p9 = pnand %p2182_p7, %p2693_p11  ;;  %s388_s8 = int_to_ptr.vmem [resolvable:$true] %s387_s8 }
  0x55   : > { %s1929_s23 = sshll.u32 %s375_s24, 4  ;;  %s376_s22 = scalar_lea.sflag [#allocation5], %s375_s24 }
  0x56   : > { %p2369_p10 = pneg %p2727_p9  ;;  %s2380_s21 = scalar_lea.vmem %s388_s8, 128 }
  0x57   : > { %p2381_p12 = scmp.ne.s32.totalorder %s388_s8, %s2380_s21  ;;  %s2527_s2 = smov [#allocation4]  }
  0x58   : > { %s2385_s6 = sshll.u32 %s2527_s2, 4  ;;  %s2386_s6 = int_to_ptr.vmem [resolvable:$false] %s2385_s6 }
  0x59   : > { %s385_s4 = scalar_lea.hbm %s2988_s0, %s1928_s29  ;;  %p2383_p6 = pnand %p2381_p12, %p2369_p10 }
  0x5a   : > { %s2387_s29 = scalar_lea.vmem %s2386_s6, 256  ;;  %p2388_p11 = scmp.lt.s32.totalorder %s388_s8, %s2386_s6 }
  0x5b   : > { %p2384_p13 = pneg %p2383_p6  ;;  %p2389_p4 = scmp.lt.s32.totalorder %s2387_s29, %s2380_s21 }
  0x5d   : > { %p2390_p7 = por %p2389_p4, %p2388_p11 }
  0x5f   : > { %p2391_p5 = pnand %p2390_p7, %p2384_p13 }
  0x61   : > { %2394 = shalt.err (!%p2391_p5)
}
  0x62   : > { %2170 = dma.hbm_to_vmem [thread:$0]  (!%p2727_p9), %s385_s4, 128, %s388_s8, %s376_s22  }
  0x63   : > { %s1973_s30 = sshll.u32 %s2515_s17, 8  ;;  %s398_s28 = scalar_lea.vmem [#allocation7], %s1929_s23 }
  0x64   : > { %s405_s24 = sshll.u32 %s398_s28, 4  ;;  %s394_s11 = sand.u32 1, %s2519_s18   ;;  %s406_s24 = int_to_ptr.vmem [resolvable:$true] %s405_s24 }
  0x65   : > { %s404_s15 = scalar_lea.hbm %s2954_s1, %s1973_s30  ;;  %s395_s6 = scalar_lea.sflag [#allocation8], %s394_s11 }
  0x66   : > { %s2408_s21 = scalar_lea.vmem %s406_s24, 256  ;;  %s2528_s29 = smov [#allocation7]  }
  0x67   : > { %p2409_p12 = scmp.ne.s32.totalorder %s406_s24, %s2408_s21  ;;  %s2413_s27 = sshll.u32 %s2528_s29, 4  ;;  %s2414_s27 = int_to_ptr.vmem [resolvable:$false] %s2413_s27 }
  0x68   : > { %s2415_s4 = scalar_lea.vmem %s2414_s27, 512  ;;  %p2416_p13 = scmp.lt.s32.totalorder %s406_s24, %s2414_s27 }
  0x69   : > { %p2411_p5 = pnand %p2409_p12, %p2369_p10  ;;  %p2417_p11 = scmp.lt.s32.totalorder %s2415_s4, %s2408_s21 }
  0x6b   : > { %p2412_p6 = pneg %p2411_p5  ;;  %p2418_p4 = por %p2417_p11, %p2416_p13 }
  0x6d   : > { %p2419_p7 = pnand %p2418_p4, %p2412_p6 }
  0x6f   : > { %2422 = shalt.err (!%p2419_p7)
}
  0x70   : > { %s2990_s0 = smov 8   ;;  %s2991_s8 = smov 128  }
  0x71   : > { %2173 = dma.hbm_to_vmem [thread:$0]  (!%p2727_p9), %s404_s15, 256, %s406_s24, %s395_s6, %s2991_s8, %s2991_s8, %s2990_s0  }
  0x72   : > { %417 = sbr.rel (%p2626_p3) target bundleno = 1970 (0x7b2), region = 60  ;;  %s2754_s23 = sand.u32 (!%p2626_p3), 1, %s2503_s14  }
  0x73   : > { %s1933_s27 = sshll.u32 (!%p2626_p3), %s2754_s23, 3  ;;  %s420_s22 = scalar_lea.sflag (!%p2626_p3), [#allocation5], %s2754_s23 }
  0x74   : > { %s2760_s30 = scalar_lea.vmem (!%p2626_p3), [#allocation4], %s1933_s27 }
  0x77   : > { %2474 = dma.done.wait (%p2704_p0), %s420_s22, 128  }
  0x78   : > { %2476 = vsyncadd (%p2704_p0), %s420_s22, 4294967168  ;;  %s428_s15 = sand.u32 1, %s2621_s19   ;;  %s1934_s20 = sshll.u32 %s2754_s23, 4 }
  0x79   : > { %s429_s26 = scalar_lea.sflag [#allocation8], %s428_s15  ;;  %s432_s28 = scalar_lea.vmem [#allocation7], %s1934_s20 }
  0x7a   : > { %2478 = dma.done.wait (%p2704_p0), %s429_s26, 256  }
  0x7b   : > { %2480 = vsyncadd (%p2704_p0), %s429_s26, 4294967040 }
  0x7c   : > { %2482 = dma.done.wait (%p66_p1), [#allocation8], 512  }
  0x7d   : > { %2484 = vsyncadd (%p66_p1), [#allocation8], 4294966784 }
  0x7e   : > { %2486 = dma.done.wait (%p66_p1), [#allocation11], 1024  }
  0x7f   : > { %2488 = vsyncadd (%p66_p1), [#allocation11], 4294966272 }
  0x80   : > { %2490 = dma.done.wait (%p66_p1), [#allocation14], 512  }
  0x81   : > { %2492 = vsyncadd (%p66_p1), [#allocation14], 4294966784  ;;  %vm508_vm0 = vcmask 261120   ;;  %v500_v0 = vld [vmem:[#allocation10 + $0x18] sm:$0xff]  ;;  %v499_v1 = vld [vmem:[#allocation10 + $0x10] sm:$0xff]  ;;  %v2529_v7 = vmov 0.0  }
  0x82   : > { %2023 = vmatprep.subr.mxu0 %v500_v0  ;;  %v495_v2 = vld [vmem:[%s432_s28] sm:$0xff]  ;;  %v498_v3 = vld [vmem:[#allocation10 + $0x8] sm:$0xff]  ;;  %v683_v6 = vld [vmem:[#allocation9 + $0x18] sm:$0xff]  ;;  %vm2530_vm1 = vmmov 0   ;;  %vm770_vm2 = vcmask 64512   ;;  %s2531_s2 = smov 120  }
  0x83   : > { %2024 = vmatpush3.msra.mxu0 %v500_v0  ;;  %2031 = vmatprep.mubr.msk.f32.mxu0 %vm508_vm0, %v495_v2  ;;  %v497_v4 = vld [vmem:[#allocation10] sm:$0xff]  ;;  %v496_v5 = vld [vmem:[%s432_s28 + $0x8] sm:$0xff]  ;;  %v682_v8 = vld [vmem:[#allocation9 + $0x10] sm:$0xff]  ;;  %vm850_vm3 = vcmask 130048   ;;  %s2532_s29 = smov 112   ;;  %s2533_s4 = smov 104  }
  0x84   : > { %2025 = vmatprep.subr.mxu0 %v499_v1  ;;  %2042 = vmatprep.mubr.msk.f32.mxu1 %vm508_vm0, %v495_v2  ;;  %v681_v9 = vld [vmem:[#allocation9 + $0x8] sm:$0xff]  ;;  %v680_v10 = vld [vmem:[#allocation9] sm:$0xff]  ;;  %v490_v11 = vld [vmem:[%s2760_s30] sm:$0xff]  ;;  %s1970_s22 = sshll.u32 %s2511_s16, 7  ;;  %s489_s30 = scalar_lea.vmem [#allocation15], %s1933_s27 }
  0x85   : > { %2026 = vmatpush3.msra.mxu0 %v499_v1  ;;  %v595_v12 = vld [vmem:[#allocation12 + $0x18] sm:$0xff]  ;;  %v594_v13 = vld [vmem:[#allocation12 + $0x10] sm:$0xff]  ;;  %v593_v14 = vld [vmem:[#allocation12 + $0x8] sm:$0xff]  ;;  %s1778_s15 = sshll.u32 %s489_s30, 4  ;;  %s1776_s28 = scalar_lea.hbm %s2963_s10, %s1970_s22  ;;  %s1779_s15 = int_to_ptr.vmem [resolvable:$true] %s1778_s15 }
  0x86   : > { %2027 = vmatprep.subr.mxu0 %v498_v3  ;;  %2034 = vmatprep.subr.mxu1 %v595_v12  ;;  %v592_v15 = vld [vmem:[#allocation12] sm:$0xff]  ;;  %v1940_v16 = vld [vmem:[%s2958_s5] ss:$0 sm:$0xff]  ;;  %v1111_v57 = vld [vmem:[#allocation13 + $0x8] sm:$0xff]  ;;  %s1764_s19 = scalar_lea.sflag [#allocation6], %s2754_s23  ;;  %s2423_s25 = scalar_lea.vmem %s1779_s15, 128 }
  0x87   : > { %2028 = vmatpush3.msra.mxu0 %v498_v3  ;;  %2035 = vmatpush3.msra.mxu1 %v595_v12  ;;  %v1946_v21 = vld [vmem:[%s2956_s3] ss:$0 sm:$0xff]  ;;  %v935_v49 = vld [vmem:[#allocation13] sm:$0xff]  ;;  %p2424_p1 = scmp.ne.s32.totalorder %s1779_s15, %s2423_s25  ;;  %s2534_s24 = smov [#allocation15]  }
  0x88   : > { %2029 = vmatprep.subr.mxu0 %v497_v4  ;;  %2036 = vmatprep.subr.mxu1 %v594_v13  ;;  %v1943_v28 = vld [vmem:[%s2960_s7] ss:$0 sm:$0xff]  ;;  %s2427_s16 = sshll.u32 %s2534_s24, 4  ;;  %s2428_s16 = int_to_ptr.vmem [resolvable:$false] %s2427_s16 }
  0x89   : > { %2030 = vmatpush3.msra.mxu0 %v497_v4  ;;  %2037 = vmatpush3.msra.mxu1 %v594_v13  ;;  %p2425_p3 = pnand %p2424_p1, %p2708_p2  ;;  %s2429_s27 = scalar_lea.vmem %s2428_s16, 256 }
  0x8a   : > { %2032 = vmatmul.mubr.msk.f32.vlgmr.msra.gmra.mxu0 %vm508_vm0, %v496_v5  ;;  %2045 = vmatprep.subr.mxu0 %v2529_v7  ;;  %p2430_p9 = scmp.lt.s32.totalorder %s1779_s15, %s2428_s16  ;;  %p2431_p10 = scmp.lt.s32.totalorder %s2429_s27, %s2423_s25 }
  0x8b   : > { %2046 = vmatpush3.msra.mxu0 %v683_v6  ;;  %2053 = vmatprep.mubr.msk.f32.mxu0 %vm2530_vm1, %v2529_v7  ;;  %p2426_p0 = pneg %p2425_p3 }
  0x8c   : > { %2047 = vmatprep.subr.mxu0 %v2529_v7  ;;  %2038 = vmatprep.subr.mxu1 %v593_v14  ;;  %p2432_p12 = por %p2431_p10, %p2430_p9 }
  0x8d   : > { %2048 = vmatpush3.msra.mxu0 %v682_v8  ;;  %2039 = vmatpush3.msra.mxu1 %v593_v14 }
  0x8e   : > { %2049 = vmatprep.subr.mxu0 %v2529_v7  ;;  %2040 = vmatprep.subr.mxu1 %v592_v15  ;;  %p2433_p5 = pnand %p2432_p12, %p2426_p0 }
  0x8f   : > { %2050 = vmatpush3.msra.mxu0 %v681_v9  ;;  %2041 = vmatpush3.msra.mxu1 %v592_v15 }
  0x90   : > { %2051 = vmatprep.subr.mxu0 %v2529_v7  ;;  %2056 = vmatprep.subr.mxu1 %v2529_v7 }
  0x91   : > { %2052 = vmatpush3.msra.mxu0 %v680_v10  ;;  %2043 = vmatmul.mubr.msk.f32.vlgmr.msra.gmra.mxu1 %vm508_vm0, %v496_v5 }
  0x92   : > { %2054 = vmatmul.mubr.msk.f32.vlgmr.msra.gmra.mxu0 %vm508_vm0, %v490_v11  ;;  %2063 = vmatprep.subr.mxu0 %v2529_v7 }
  0x93   : > { %2067 = vmatprep.mubr.msk.f32.mxu0 %vm2530_vm1, %v2529_v7  ;;  %2060 = vmatprep.mubr.msk.f32.mxu1 %vm2530_vm1, %v2529_v7 }
 0x14a   : > { %v2033_v17 = vpop.f32.mrf.mxu0 }
 0x14b   : > { %v587_v18 = vadd.f32 %v2033_v17, %v1940_v16 }
 0x14c   : > { %v581_v19 = vpop.f32.mrf.mxu0 }
 0x14d   : > { %591 = vst.msk [vmem:[#allocation2 + $0x8] sm:$0xff] %vm508_vm0, %v587_v18  ;;  %v582_v20 = vadd.f32 %v1940_v16, %v581_v19 }
 0x14f   : > { %590 = vst.msk [vmem:[#allocation2] sm:$0xff] %vm508_vm0, %v582_v20 }
 0x151   : > { %v2044_v29 = vpop.f32.mrf.mxu1 }
 0x152   : > { %v761_v22 = vpop.f32.mrf.mxu0  ;;  %v675_v30 = vadd.f32 %v2044_v29, %v1943_v28 }
 0x153   : > { %v762_v23 = vadd.f32 %v1946_v21, %v761_v22  ;;  %v669_v31 = vpop.f32.mrf.mxu1 }
 0x154   : > { %v767_v24 = vld [vmem:[#allocation2 + $0x8] sm:$0xff]  ;;  %v2055_v25 = vpop.f32.mrf.mxu0  ;;  %679 = vst.msk [vmem:[#allocation3 + $0x8] sm:$0xff] %vm508_vm0, %v675_v30  ;;  %v670_v32 = vadd.f32 %v1943_v28, %v669_v31  ;;  %v1431_v28 = vld [vmem:[#allocation13 + $0x10] sm:$0xff] }
 0x155   : > { %940 = vrot.lane.b32.xlu0 %v767_v24, %s2531_s2  ;;  %v765_v26 = vmul.f32 0.35355338, %v762_v23  ;;  %2057 = vmatpush3.xpose.msk.msra.mxu1 %vm770_vm2, %v767_v24 }
 0x156   : > { %2058 = vmatprep.subr.mxu1 %v2529_v7  ;;  %v766_v27 = vld [vmem:[#allocation2] sm:$0xff]  ;;  %678 = vst.msk [vmem:[#allocation3] sm:$0xff] %vm508_vm0, %v670_v32 }
 0x157   : > { %936 = vrot.lane.b32.xlu1 %v765_v26, %s2531_s2 }
 0x159   : > { %938 = vrot.lane.b32.xlu0 %v766_v27, %s2531_s2  ;;  %2059 = vmatpush3.xpose.msk.msra.mxu1 %vm770_vm2, %v766_v27 }
 0x15a   : > { %2070 = vmatprep.subr.mxu1 %v2529_v7 }
 0x15b   : > { %v2825_v33 = vld [vmem:[#allocation3 + $0x8] sm:$0xff] }
 0x15c   : > { %2061 = vmatmul.mubr.msk.f32.vlgmr.msra.gmra.mxu1 %vm770_vm2, %v765_v26  ;;  %2064 = vmatpush3.msra.mxu0 %v2825_v33 }
 0x15d   : > { %2074 = vmatprep.mubr.msk.f32.mxu1 %vm2530_vm1, %v2529_v7  ;;  %2065 = vmatprep.subr.mxu0 %v2529_v7  ;;  %v2829_v34 = vld [vmem:[#allocation3] sm:$0xff] }
 0x15e   : > { %2066 = vmatpush3.msra.mxu0 %v2829_v34 }
 0x15f   : > { %2077 = vmatprep.subr.mxu0 %v2529_v7 }
 0x1c7   : > { %v941_v35 = vpop.permute.xlu0 %940 }
 0x1c8   : > { %2071 = vmatpush3.xpose.msk.msra.mxu1 %vm770_vm2, %v941_v35 }
 0x1c9   : > { %2072 = vmatprep.subr.mxu1 %v2529_v7  ;;  %v937_v37 = vpop.permute.xlu1 %936 }
 0x1cb   : > { %v939_v36 = vpop.permute.xlu0 %938 }
 0x1cc   : > { %2073 = vmatpush3.xpose.msk.msra.mxu1 %vm770_vm2, %v939_v36 }
 0x1cd   : > { %2089 = vmatprep.subr.mxu1 %v2529_v7 }
 0x1cf   : > { %2075 = vmatmul.mubr.msk.f32.vlgmr.msra.gmra.mxu1 %vm770_vm2, %v937_v37 }
 0x1d0   : > { %2091 = vmatprep.mubr.msk.f32.mxu1 %vm2530_vm1, %v2529_v7  ;;  %2090 = vmatpush3.msra.mxu1 %v935_v49 }
 0x1d1   : > { %2101 = vmatprep.subr.mxu1 %v2529_v7 }
 0x21c   : > { %v846_v38 = vpop.f32.mrf.mxu1 }
 0x21d   : > { %v851_v39 = vsel %vm850_vm3, %v846_v38, -inf }
 0x21e   : > { %852 = vmax.xlane.f32.xlu1 %v851_v39  ;;  %v2062_v40 = vpop.f32.mrf.mxu1 }
 0x22f   : > { %1029 = vrot.lane.b32.xlu1 %v2829_v34, %s2531_s2 }
 0x28f   : > { %v1014_v41 = vpop.f32.mrf.mxu1 }
 0x290   : > { %v1018_v42 = vsel %vm850_vm3, %v1014_v41, -inf }
 0x291   : > { %1019 = vmax.xlane.f32.xlu0 %v1018_v42  ;;  %v2076_v43 = vpop.f32.mrf.mxu1 }
 0x2a7   : > { %v853_v44 = vpop.xlane.xlu1 %852  ;;  %1031 = vrot.lane.b32.xlu0 %v2825_v33, %s2531_s2 }
 0x2a8   : > { %v854_v45 = vsub.f32 %v846_v38, %v853_v44 }
 0x2aa   : > { %v855_v46 = vmul.f32 1.442695, %v854_v45 }
 0x2ab   : > { %1262 = vrot.lane.b32.xlu0 %v767_v24, %s2532_s29  ;;  %v1030_v54 = vpop.permute.xlu1 %1029 }
 0x2ac   : > { %2247 = vpow2.f32 %v855_v46 }
 0x2af   : > { %1260 = vrot.lane.b32.xlu0 %v766_v27, %s2532_s29 }
 0x2b3   : > { %1258 = vrot.lane.b32.xlu0 %v765_v26, %s2532_s29 }
 0x2b7   : > { %1510 = vrot.lane.b32.xlu0 %v767_v24, %s2533_s4 }
 0x2b9   : > { %v2248_v47 = vpop.eup %2247 }
 0x2ba   : > { %2068 = vmatmul.mubr.msk.f32.vlgmr.msra.gmra.mxu0 %vm850_vm3, %v2248_v47  ;;  %v857_v48 = vsel %vm850_vm3, %v2248_v47, 0.0 }
 0x2bb   : > { %1508 = vrot.lane.b32.xlu0 %v766_v27, %s2533_s4  ;;  %2081 = vmatprep.mubr.msk.f32.mxu0 %vm2530_vm1, %v2529_v7 }
 0x2bf   : > { %1506 = vrot.lane.b32.xlu0 %v765_v26, %s2533_s4 }
 0x2de   : > { %858 = vadd.xlane.f32.xlu0 %v857_v48 }
 0x2f4   : > { %1599 = vrot.lane.b32.xlu0 %v2825_v33, %s2533_s4 }
 0x31a   : > { %v1020_v50 = vpop.xlane.xlu0 %1019 }
 0x31b   : > { %v1021_v51 = vsub.f32 %v1014_v41, %v1020_v50  ;;  %v1679_v41 = vld [vmem:[#allocation13 + $0x18] sm:$0xff] }
 0x31d   : > { %v1022_v52 = vmul.f32 1.442695, %v1021_v51 }
 0x31e   : > { %v1032_v53 = vpop.permute.xlu0 %1031 }
 0x31f   : > { %2249 = vpow2.f32 %v1022_v52  ;;  %2078 = vmatpush3.msra.mxu0 %v1032_v53 }
 0x320   : > { %2079 = vmatprep.subr.mxu0 %v2529_v7 }
 0x321   : > { %2080 = vmatpush3.msra.mxu0 %v1030_v54 }
 0x322   : > { %2084 = vmatprep.subr.mxu0 %v2529_v7  ;;  %v1263_v58 = vpop.permute.xlu0 %1262 }
 0x326   : > { %v1261_v59 = vpop.permute.xlu0 %1260 }
 0x32a   : > { %v1259_v60 = vpop.permute.xlu0 %1258 }
 0x32c   : > { %v2250_v55 = vpop.eup %2249 }
 0x32d   : > { %2082 = vmatmul.mubr.msk.f32.vlgmr.msra.gmra.mxu0 %vm850_vm3, %v2250_v55  ;;  %v1024_v56 = vsel %vm850_vm3, %v2250_v55, 0.0 }
 0x32e   : > { %1025 = vadd.xlane.f32.xlu1 %v1024_v56  ;;  %2086 = vmatprep.mubr.msk.f32.mxu0 %vm2530_vm1, %v2529_v7  ;;  %v1511_v61 = vpop.permute.xlu0 %1510 }
 0x32f   : > { %2085 = vmatpush3.msra.mxu0 %v1111_v57 }
 0x330   : > { %2094 = vmatprep.subr.mxu0 %v2529_v7 }
 0x332   : > { %v1509_v62 = vpop.permute.xlu0 %1508 }
 0x336   : > { %v1507_v63 = vpop.permute.xlu0 %1506 }
 0x33f   : > { %1351 = vrot.lane.b32.xlu1 %v2825_v33, %s2532_s29 }
 0x367   : > { %v859_v0 = vpop.xlane.xlu0 %858 }
 0x368   : > { %2251 = vrcp.f32 %v859_v0 }
 0x36b   : > { %v1600_v35 = vpop.permute.xlu0 %1599 }
 0x375   : > { %v2252_v1 = vpop.eup %2251 }
 0x37a   : > { %v929_v2 = vpop.f32.mrf.mxu0 }
 0x37b   : > { %v934_v3 = vmul.f32 %v2252_v1, %v929_v2 }
 0x37c   : > { %v2069_v4 = vpop.f32.mrf.mxu0 }
 0x37d   : > { %2092 = vmatmul.mubr.msk.f32.vlgmr.msra.gmra.mxu1 %vm770_vm2, %v934_v3 }
 0x37e   : > { %2105 = vmatprep.mubr.msk.f32.mxu1 %vm2530_vm1, %v2529_v7 }
 0x3b7   : > { %v1026_v5 = vpop.xlane.xlu1 %1025 }
 0x3b8   : > { %2253 = vrcp.f32 %v1026_v5 }
 0x3bb   : > { %v1352_v6 = vpop.permute.xlu1 %1351 }
 0x3bc   : > { %2102 = vmatpush3.msra.mxu1 %v1352_v6 }
 0x3bd   : > { %2103 = vmatprep.subr.mxu1 %v2529_v7 }
 0x3c5   : > { %v2254_v8 = vpop.eup %2253 }
 0x3ed   : > { %v1104_v9 = vpop.f32.mrf.mxu0 }
 0x3ee   : > { %v1109_v10 = vmul.f32 %v2254_v8, %v1104_v9 }
 0x3ef   : > { %v2083_v11 = vpop.f32.mrf.mxu0 }
 0x3f0   : > { %2087 = vmatmul.mubr.msk.f32.vlgmr.msra.gmra.mxu0 %vm770_vm2, %v1109_v10 }
 0x3f1   : > { %2095 = vmatpush3.xpose.msk.msra.mxu0 %vm770_vm2, %v1263_v58  ;;  %2098 = vmatprep.mubr.msk.f32.mxu0 %vm2530_vm1, %v2529_v7 }
 0x3f2   : > { %2096 = vmatprep.subr.mxu0 %v2529_v7 }
 0x3f5   : > { %2097 = vmatpush3.xpose.msk.msra.mxu0 %vm770_vm2, %v1261_v59 }
 0x3f6   : > { %2113 = vmatprep.subr.mxu0 %v2529_v7 }
 0x3f8   : > { %2099 = vmatmul.mubr.msk.f32.vlgmr.msra.gmra.mxu0 %vm770_vm2, %v1259_v60 }
 0x3f9   : > { %2114 = vmatpush3.xpose.msk.msra.mxu0 %vm770_vm2, %v1511_v61  ;;  %2117 = vmatprep.mubr.msk.f32.mxu0 %vm2530_vm1, %v2529_v7 }
 0x3fa   : > { %2115 = vmatprep.subr.mxu0 %v2529_v7 }
 0x3fd   : > { %2116 = vmatpush3.xpose.msk.msra.mxu0 %vm770_vm2, %v1509_v62 }
 0x400   : > { %2118 = vmatmul.mubr.msk.f32.vlgmr.msra.gmra.mxu0 %vm770_vm2, %v1507_v63 }
 0x43d   : > { %v1254_v12 = vpop.f32.mrf.mxu1 }
 0x43f   : > { %v2093_v13 = vpop.f32.mrf.mxu1 }
 0x4b0   : > { %v1181_v14 = vpop.f32.mrf.mxu0 }
 0x4b1   : > { %v1255_v43 = vadd.f32 %v1254_v12, %v1181_v14 }
 0x4b2   : > { %v2088_v15 = vpop.f32.mrf.mxu0 }
 0x4b8   : > { %v1336_v16 = vpop.f32.mrf.mxu0 }
 0x4b9   : > { %v1340_v17 = vsel %vm850_vm3, %v1336_v16, -inf }
 0x4ba   : > { %1341 = vmax.xlane.f32.xlu1 %v1340_v17  ;;  %v2100_v18 = vpop.f32.mrf.mxu0 }
 0x4c0   : > { %v1584_v19 = vpop.f32.mrf.mxu0 }
 0x4c1   : > { %v1588_v21 = vsel %vm850_vm3, %v1584_v19, -inf }
 0x4c2   : > { %v2119_v20 = vpop.f32.mrf.mxu0 }
 0x4cb   : > { %1349 = vrot.lane.b32.xlu1 %v2829_v34, %s2532_s29 }
 0x4ef   : > { %1589 = vmax.xlane.f32.xlu1 %v1588_v21 }
 0x543   : > { %v1342_v22 = vpop.xlane.xlu1 %1341 }
 0x544   : > { %v1343_v23 = vsub.f32 %v1336_v16, %v1342_v22 }
 0x546   : > { %v1344_v24 = vmul.f32 1.442695, %v1343_v23 }
 0x547   : > { %v1350_v25 = vpop.permute.xlu1 %1349 }
 0x548   : > { %2255 = vpow2.f32 %v1344_v24  ;;  %2104 = vmatpush3.msra.mxu1 %v1350_v25 }
 0x549   : > { %2108 = vmatprep.subr.mxu1 %v2529_v7 }
 0x555   : > { %v2256_v26 = vpop.eup %2255 }
 0x556   : > { %2106 = vmatmul.mubr.msk.f32.vlgmr.msra.gmra.mxu1 %vm850_vm3, %v2256_v26  ;;  %v1346_v27 = vsel %vm850_vm3, %v2256_v26, 0.0 }
 0x557   : > { %1347 = vadd.xlane.f32.xlu0 %v1346_v27  ;;  %2110 = vmatprep.mubr.msk.f32.mxu1 %vm2530_vm1, %v2529_v7 }
 0x558   : > { %2109 = vmatpush3.msra.mxu1 %v1431_v28 }
 0x559   : > { %2120 = vmatprep.subr.mxu1 %v2529_v7 }
 0x56d   : > { %1597 = vrot.lane.b32.xlu0 %v2829_v34, %s2533_s4 }
 0x578   : > { %v1590_v29 = vpop.xlane.xlu1 %1589 }
 0x579   : > { %v1591_v30 = vsub.f32 %v1584_v19, %v1590_v29 }
 0x57b   : > { %v1592_v31 = vmul.f32 1.442695, %v1591_v30 }
 0x57d   : > { %2257 = vpow2.f32 %v1592_v31 }
 0x58a   : > { %v2258_v32 = vpop.eup %2257 }
 0x58b   : > { %v1594_v33 = vsel %vm850_vm3, %v2258_v32, 0.0 }
 0x58c   : > { %1595 = vadd.xlane.f32.xlu0 %v1594_v33 }
 0x5e0   : > { %v1348_v36 = vpop.xlane.xlu0 %1347 }
 0x5e1   : > { %2259 = vrcp.f32 %v1348_v36 }
 0x5e4   : > { %v1598_v34 = vpop.permute.xlu0 %1597 }
 0x5ee   : > { %v2260_v37 = vpop.eup %2259 }
 0x615   : > { %v1596_v42 = vpop.xlane.xlu0 %1595 }
 0x616   : > { %v1424_v38 = vpop.f32.mrf.mxu1  ;;  %2261 = vrcp.f32 %v1596_v42 }
 0x617   : > { %v1429_v39 = vmul.f32 %v2260_v37, %v1424_v38 }
 0x618   : > { %v2107_v40 = vpop.f32.mrf.mxu1 }
 0x619   : > { %2111 = vmatmul.mubr.msk.f32.vlgmr.msra.gmra.mxu1 %vm770_vm2, %v1429_v39 }
 0x61a   : > { %2121 = vmatpush3.msra.mxu1 %v1600_v35  ;;  %2124 = vmatprep.mubr.msk.f32.mxu1 %vm2530_vm1, %v2529_v7 }
 0x61b   : > { %2122 = vmatprep.subr.mxu1 %v2529_v7 }
 0x61c   : > { %2123 = vmatpush3.msra.mxu1 %v1598_v34 }
 0x61d   : > { %2125 = vmatmul.mubr.msk.f32.vlgmr.msra.gmra.mxu1 %vm850_vm3, %v2258_v32  ;;  %2127 = vmatprep.subr.mxu1 %v2529_v7 }
 0x61e   : > { %2129 = vmatprep.mubr.msk.f32.mxu1 %vm2530_vm1, %v2529_v7  ;;  %2128 = vmatpush3.msra.mxu1 %v1679_v41  ;;  %v1968_v7 = vld [vmem:[%s2962_s9] ss:$0 sm:$0xff] }
 0x623   : > { %v2262_v47 = vpop.eup %2261 }
 0x6d9   : > { %v1501_v44 = vpop.f32.mrf.mxu1 }
 0x6da   : > { %v1505_v45 = vadd.f32 %v1501_v44, %v1255_v43 }
 0x6db   : > { %v2112_v46 = vpop.f32.mrf.mxu1 }
 0x6dd   : > { %v1672_v48 = vpop.f32.mrf.mxu1 }
 0x6de   : > { %v1677_v49 = vmul.f32 %v2262_v47, %v1672_v48 }
 0x6df   : > { %v2126_v50 = vpop.f32.mrf.mxu1 }
 0x6e0   : > { %2130 = vmatmul.mubr.msk.f32.vlgmr.msra.gmra.mxu1 %vm770_vm2, %v1677_v49 }
 0x7a0   : > { %v1749_v51 = vpop.f32.mrf.mxu1 }
 0x7a1   : > { %v1753_v52 = vadd.f32 %v1749_v51, %v1505_v45 }
 0x7a2   : > { %v2131_v53 = vpop.f32.mrf.mxu1 }
 0x7a3   : > { %v1761_v54 = vadd.f32 %v1968_v7, %v1753_v52 }
 0x7a5   : > { %1762 = vst [vmem:[%s489_s30] sm:$0xff] %v1761_v54 }
 0x7a6   : > { %2436 = shalt.err (!%p2433_p5)
}
 0x7a7   : > { %s2437_s11 = scalar_lea.hbm %s1776_s28, 128  ;;  %s2441_s6 = scalar_lea.hbm %s2963_s10, 256 }
 0x7a8   : > { %p2438_p6 = scmp.ne.s32.totalorder %s1776_s28, %s2437_s11  ;;  %p2442_p4 = scmp.lt.s32.totalorder %s1776_s28, %s2963_s10 }
 0x7a9   : > { %p2443_p7 = scmp.lt.s32.totalorder %s2441_s6, %s2437_s11 }
 0x7aa   : > { %p2439_p13 = pnand %p2438_p6, %p2708_p2 }
 0x7ab   : > { %p2444_p1 = por %p2443_p7, %p2442_p4 }
 0x7ac   : > { %p2440_p11 = pneg %p2439_p13 }
 0x7ae   : > { %p2445_p3 = pnand %p2444_p1, %p2440_p11 }
 0x7b0   : > { %2448 = shalt.err (!%p2445_p3)
}
 0x7b1   : > { %2152 = dma.vmem_to_hbm [thread:$0]  (%p2708_p2), %s1779_s15, 128, %s1776_s28, %s1764_s19  }
 0x7b2 PF: > { %s1790_s0 = sand.u32 1, %s2499_s13   ;;  %p2993_p0 = scmp.ge.s32.totalorder %s2519_s18, 2 }
 0x7b3   : > { %s1791_s8 = scalar_lea.sflag [#allocation6], %s1790_s0 }
 0x7b4   : > { %p2175_p9 = pnand %p2993_p0, %p2715_p8 }
 0x7b6   : > { %p2176_p10 = pneg %p2175_p9 }
 0x7b8   : > { %2494 = dma.done.wait (%p2176_p10), %s1791_s8, 128  }
 0x7b9   : > { %2496 = vsyncadd (%p2176_p10), %s1791_s8, 4294967168  ;;  %s31_s18 = sadd.s32 1, %s2519_s18   ;;  %s2994_s22 = sld [smem:[#allocation22_spill]] }
 0x7ba   : > { %p28_p12 = scmp.ge.s32.totalorder %s31_s18, 4   ;;  %s2995_s15 = sld [smem:[#allocation24_spill]] }
 0x7bb   : > { %s2996_s12 = sld [smem:[#allocation23_spill]]  ;;  %s2997_s13 = smov %s2503_s14 }
 0x7bc   : > { %s2999_s16 = smov %s2515_s17 }
 0x7bd   :  { %30 = sbr.rel (!%p28_p12) target bundleno = 16 (0x10), region = 141 }
 0x7bf   : > { %s2998_s14 = smov %s2994_s22 }
 0x7c1   : > { %s3000_s17 = smov %s2996_s12 }
 0x7c2   :  { %1796 = vsyncpa [#allocation5], 1 }
 0x7c3   :  { %1798 = vsyncpa [#allocation5 + $0x1], 1 }
 0x7c4   :  { %1799 = vsyncpa [#allocation8], 1 }
 0x7c5   :  { %1801 = vsyncpa [#allocation8 + $0x1], 1 }
 0x7c6   :  { %1802 = vsyncpa [#allocation11], 1 }
 0x7c7   :  { %1803 = vsyncpa [#allocation14], 1 }
 0x7c8   :  { %1804 = vsyncpa [#allocation6], 1 }
 0x7c9   :  { %1806 = vsyncpa [#allocation6 + $0x1], 1 }

</bundles_post_ra>
